<compile_context>
chip_gen: v7x
topology: tpu7x:2x2x1
jax: 0.10.0
libtpu: 0.0.40
codegen_flags: <defaults>
</compile_context>

<pallas_src>
import jax
import jax.numpy as jnp
from jax.experimental import pallas as pl
from jax.experimental.pallas import tpu as pltpu

_LANE = 128      # lane width (last-dim VMEM tiling unit)
_SUBLANE = 8     # sublane width (second-to-last-dim VMEM tiling unit)
_F32 = 4         # bytes


def _round_up(x, m):
    return ((x + m - 1) // m) * m


def _autoencoder_kernel(x_ref, w1_ref, b1_ref, w23_ref, b23_ref, w4_ref, b4_ref,
                        out_ref):
    x = x_ref[...]                                           # (tile_b, D) f32

    # encoder: Linear(D, 8) -> ReLU
    h1 = jnp.dot(x, w1_ref[...], preferred_element_type=jnp.float32) + b1_ref[...]
    h1 = jnp.maximum(h1, 0.0)

    # folded encoder Linear(8,4) . decoder Linear(4,8)  (no nonlinearity between
    # the two original layers, so the fold is exact) -> ReLU
    h2 = jnp.dot(h1, w23_ref[...], preferred_element_type=jnp.float32) + b23_ref[...]
    h2 = jnp.maximum(h2, 0.0)

    # decoder: Linear(8, D)
    y = jnp.dot(h2, w4_ref[...], preferred_element_type=jnp.float32) + b4_ref[...]
    out_ref[...] = y.astype(out_ref.dtype)


def _build_call(B, input_dim, tile_b, dtype, vmem_limit, cost, single_buffer_weights):
    """Construct the pallas_call for the given tiling."""
    if single_buffer_weights:
        def wspec(shape):
            # Constant-index blocks: one VMEM buffer is enough.
            return pl.BlockSpec(shape, lambda i: (0, 0), pipeline_mode=pl.Buffered(1))
    else:
        def wspec(shape):
            return pl.BlockSpec(shape, lambda i: (0, 0))

    grid = (pl.cdiv(B, tile_b),)
    return pl.pallas_call(
        _autoencoder_kernel,
        out_shape=jax.ShapeDtypeStruct((B, input_dim), dtype),
        grid=grid,
        in_specs=[
            pl.BlockSpec((tile_b, input_dim), lambda i: (i, 0)),  # x (pipelined)
            wspec((input_dim, 8)),                                # w1  (resident)
            wspec((1, 8)),                                        # b1
            wspec((8, 8)),                                        # w23
            wspec((1, 8)),                                        # b23
            wspec((8, input_dim)),                                # w4
            wspec((1, input_dim)),                                # b4
        ],
        out_specs=pl.BlockSpec((tile_b, input_dim), lambda i: (i, 0)),
        compiler_params=pltpu.CompilerParams(
            dimension_semantics=("parallel",),   # shard batch tiles across TCs
            vmem_limit_bytes=vmem_limit,
        ),
        cost_estimate=cost,
    )


def autoencoder_forward(x, params, *, max_tile_b=4096):
    """x: (B, input_dim) float32. params: (in, out) weights and (1, out) biases."""
    B, input_dim = x.shape
    d_lane = _round_up(input_dim, _LANE)   # VMEM lane footprint of the feature axis

    # Fold the middle two linear layers in the wrapper (runs once under jit).
    w23 = params["w2"] @ params["w3"]                      # (8, 8)
    b23 = params["b2"] @ params["w3"] + params["b3"]       # (1, 8)
    w1, b1 = params["w1"], params["b1"]
    w4, b4 = params["w4"], params["b4"]

    # ---- VMEM accounting (includes (8,128)-tile padding of the VMEM layout) ----
    # Weights/biases are constant across the grid; counted at 2 buffers to stay
    # conservative even if the single-buffer request is ignored.
    weight_bytes = (
        _round_up(input_dim, _SUBLANE) * _LANE * _F32      # w1 (input_dim, 8)
        + 3 * _SUBLANE * _LANE * _F32                      # b1, w23, b23
        + 2 * _SUBLANE * d_lane * _F32                     # w4, b4
    )
    bytes_per_row = 2 * 2 * d_lane * _F32                  # x + out, double-buffered

    tile_budget = 24 * 1024 * 1024                         # safe on v5e/v6e/v7x
    rows_fit = max(_SUBLANE,
                   ((tile_budget - 2 * weight_bytes) // bytes_per_row)
                   // _SUBLANE * _SUBLANE)
    tile_b = max(_SUBLANE, min(max_tile_b, rows_fit, _round_up(B, _SUBLANE)))

    # v7x megacore: make sure the grid has >= 2 steps so the "parallel" batch
    # axis really lands on both TensorCores (free for a memory-bound stream).
    if pl.cdiv(B, tile_b) < 2 and tile_b > _SUBLANE:
        tile_b = max(_SUBLANE, _round_up(pl.cdiv(B, 2), _SUBLANE))

    vmem_need = 2 * weight_bytes + tile_b * bytes_per_row
    vmem_limit = int(min(max(vmem_need + vmem_need // 2, 32 * 1024 * 1024),
                         64 * 1024 * 1024))

    cost = pl.CostEstimate(
        flops=int(32 * B * input_dim + 128 * B),                       # 3 matmuls
        transcendentals=0,
        bytes_accessed=int(_F32 * (2 * B * input_dim                   # x + out
                                   + 17 * input_dim + 80)),            # weights
    )

    args = (x, w1, b1, w23, b23, w4, b4)
    try:
        out = _build_call(B, input_dim, tile_b, x.dtype, vmem_limit, cost,
                          single_buffer_weights=True)(*args)
    except Exception:
        # Fallback for jax versions that reject pipeline_mode=pl.Buffered(1);
        # identical math, weights just get the default double buffer.
        out = _build_call(B, input_dim, tile_b, x.dtype, vmem_limit, cost,
                          single_buffer_weights=False)(*args)
    return out


def init_params(key, input_dim):
    """PyTorch nn.Linear-style init (uniform +/- 1/sqrt(fan_in)); weights (in, out)."""
    def linear(k, fan_in, fan_out):
        kw, kb = jax.random.split(k)
        bound = 1.0 / jnp.sqrt(float(fan_in))
        w = jax.random.uniform(kw, (fan_in, fan_out), jnp.float32, -bound, bound)
        b = jax.random.uniform(kb, (1, fan_out), jnp.float32, -bound, bound)
        return w, b

    k1, k2, k3, k4 = jax.random.split(key, 4)
    w1, b1 = linear(k1, input_dim, 8)
    w2, b2 = linear(k2, 8, 4)
    w3, b3 = linear(k3, 4, 8)
    w4, b4 = linear(k4, 8, input_dim)
    return {"w1": w1, "b1": b1, "w2": w2, "b2": b2,
            "w3": w3, "b3": b3, "w4": w4, "b4": b4}


def reference_forward(x, p):
    """Pure-JAX reference matching PyTorch semantics (unfolded)."""
    h = jnp.maximum(x @ p["w1"] + p["b1"], 0.0)
    z = h @ p["w2"] + p["b2"]
    d = jnp.maximum(z @ p["w3"] + p["b3"], 0.0)
    return d @ p["w4"] + p["b4"]


if __name__ == "__main__":
    key = jax.random.PRNGKey(0)
    k_x, k_p = jax.random.split(key)

    B = 12           # exercises the masked partial last batch block (tile_b=8 -> grid=2)
    input_dim = 32   # feature dim stays un-padded (masked lane stores, no host copies)

    x = jax.random.normal(k_x, (B, input_dim), dtype=jnp.float32)
    params = init_params(k_p, input_dim)

    out = jax.block_until_ready(autoencoder_forward(x, params))

    ref = reference_forward(x, params)
    assert out.shape == (B, input_dim)
    assert jnp.allclose(out, ref, atol=1e-5, rtol=1e-4), "mismatch vs reference"

    print("KERNEL_OK")
</pallas_src>

<mosaic_0001>
module attributes {stable_mosaic.version = 11 : i64} {
  func.func @_autoencoder_kernel(%arg0: i32, %arg1: memref<8x32xf32, #tpu.memory_space<vmem>>, %arg2: memref<32x8xf32, #tpu.memory_space<vmem>>, %arg3: memref<1x8xf32, #tpu.memory_space<vmem>>, %arg4: memref<8x8xf32, #tpu.memory_space<vmem>>, %arg5: memref<1x8xf32, #tpu.memory_space<vmem>>, %arg6: memref<8x32xf32, #tpu.memory_space<vmem>>, %arg7: memref<1x32xf32, #tpu.memory_space<vmem>>, %arg8: memref<8x32xf32, #tpu.memory_space<vmem>>) attributes {dimension_semantics = [#tpu.dimension_semantics<parallel>], iteration_bounds = array<i64: 2>, scalar_prefetch = 0 : i64, scratch_operands = 0 : i64, tpu.core_type = #tpu.core_type<tc>, window_params = [{transform_indices = @transform_0, window_bounds = array<i64: 8, 32>}, {pipeline_mode = #tpu.pipeline_mode<synchronous>, transform_indices = @transform_1, window_bounds = array<i64: 32, 8>}, {pipeline_mode = #tpu.pipeline_mode<synchronous>, transform_indices = @transform_2, window_bounds = array<i64: 1, 8>}, {pipeline_mode = #tpu.pipeline_mode<synchronous>, transform_indices = @transform_3, window_bounds = array<i64: 8, 8>}, {pipeline_mode = #tpu.pipeline_mode<synchronous>, transform_indices = @transform_4, window_bounds = array<i64: 1, 8>}, {pipeline_mode = #tpu.pipeline_mode<synchronous>, transform_indices = @transform_5, window_bounds = array<i64: 8, 32>}, {pipeline_mode = #tpu.pipeline_mode<synchronous>, transform_indices = @transform_6, window_bounds = array<i64: 1, 32>}, {transform_indices = @transform_7, window_bounds = array<i64: 8, 32>}]} {
    %c0 = arith.constant 0 : index
    %c0_0 = arith.constant 0 : index
    %0 = vector.load %arg1[%c0, %c0_0] : memref<8x32xf32, #tpu.memory_space<vmem>>, vector<8x32xf32>
    %c0_1 = arith.constant 0 : index
    %c0_2 = arith.constant 0 : index
    %1 = vector.load %arg2[%c0_1, %c0_2] : memref<32x8xf32, #tpu.memory_space<vmem>>, vector<32x8xf32>
    %cst = arith.constant dense<0.000000e+00> : vector<8x8xf32>
    %2 = tpu.matmul %0, %1, %cst {dimension_numbers = #tpu.dot_dimension_numbers<[1], [0], [0], [1], [0, 0, 1, 1], [], []>} : vector<8x32xf32>, vector<32x8xf32>, vector<8x8xf32> -> vector<8x8xf32>
    %c0_3 = arith.constant 0 : index
    %c0_4 = arith.constant 0 : index
    %3 = vector.load %arg3[%c0_3, %c0_4] : memref<1x8xf32, #tpu.memory_space<vmem>>, vector<1x8xf32>
    %4 = vector.broadcast %3 : vector<1x8xf32> to vector<8x8xf32>
    %5 = arith.addf %2, %4 : vector<8x8xf32>
    %cst_5 = arith.constant 0.000000e+00 : f32
    %6 = vector.broadcast %cst_5 : f32 to vector<8x8xf32>
    %7 = arith.maximumf %5, %6 : vector<8x8xf32>
    %c0_6 = arith.constant 0 : index
    %c0_7 = arith.constant 0 : index
    %8 = vector.load %arg4[%c0_6, %c0_7] : memref<8x8xf32, #tpu.memory_space<vmem>>, vector<8x8xf32>
    %cst_8 = arith.constant dense<0.000000e+00> : vector<8x8xf32>
    %9 = tpu.matmul %7, %8, %cst_8 {dimension_numbers = #tpu.dot_dimension_numbers<[1], [0], [0], [1], [0, 0, 1, 1], [], []>} : vector<8x8xf32>, vector<8x8xf32>, vector<8x8xf32> -> vector<8x8xf32>
    %c0_9 = arith.constant 0 : index
    %c0_10 = arith.constant 0 : index
    %10 = vector.load %arg5[%c0_9, %c0_10] : memref<1x8xf32, #tpu.memory_space<vmem>>, vector<1x8xf32>
    %11 = vector.broadcast %10 : vector<1x8xf32> to vector<8x8xf32>
    %12 = arith.addf %9, %11 : vector<8x8xf32>
    %cst_11 = arith.constant 0.000000e+00 : f32
    %13 = vector.broadcast %cst_11 : f32 to vector<8x8xf32>
    %14 = arith.maximumf %12, %13 : vector<8x8xf32>
    %c0_12 = arith.constant 0 : index
    %c0_13 = arith.constant 0 : index
    %15 = vector.load %arg6[%c0_12, %c0_13] : memref<8x32xf32, #tpu.memory_space<vmem>>, vector<8x32xf32>
    %cst_14 = arith.constant dense<0.000000e+00> : vector<8x32xf32>
    %16 = tpu.matmul %14, %15, %cst_14 {dimension_numbers = #tpu.dot_dimension_numbers<[1], [0], [0], [1], [0, 0, 1, 1], [], []>} : vector<8x8xf32>, vector<8x32xf32>, vector<8x32xf32> -> vector<8x32xf32>
    %c0_15 = arith.constant 0 : index
    %c0_16 = arith.constant 0 : index
    %17 = vector.load %arg7[%c0_15, %c0_16] : memref<1x32xf32, #tpu.memory_space<vmem>>, vector<1x32xf32>
    %18 = vector.broadcast %17 : vector<1x32xf32> to vector<8x32xf32>
    %19 = arith.addf %16, %18 : vector<8x32xf32>
    %c0_17 = arith.constant 0 : index
    %c0_18 = arith.constant 0 : index
    %20 = vector.load %arg8[%c0_17, %c0_18] : memref<8x32xf32, #tpu.memory_space<vmem>>, vector<8x32xf32>
    tpu.vector_store %arg8[%c0_17, %c0_18], %19 {strides = array<i32>} : memref<8x32xf32, #tpu.memory_space<vmem>>, vector<8x32xf32>,
    return
  }
  func.func @transform_0(%arg0: i32) -> (i32, i32) {
    %c0_i32 = arith.constant 0 : i32
    %c0_i32_0 = arith.constant 0 : i32
    return %arg0, %c0_i32 : i32, i32
  }
  func.func @transform_1(%arg0: i32) -> (i32, i32) {
    %c0_i32 = arith.constant 0 : i32
    %c0_i32_0 = arith.constant 0 : i32
    %c0_i32_1 = arith.constant 0 : i32
    return %c0_i32, %c0_i32_0 : i32, i32
  }
  func.func @transform_2(%arg0: i32) -> (i32, i32) {
    %c0_i32 = arith.constant 0 : i32
    %c0_i32_0 = arith.constant 0 : i32
    %c0_i32_1 = arith.constant 0 : i32
    return %c0_i32, %c0_i32_0 : i32, i32
  }
  func.func @transform_3(%arg0: i32) -> (i32, i32) {
    %c0_i32 = arith.constant 0 : i32
    %c0_i32_0 = arith.constant 0 : i32
    %c0_i32_1 = arith.constant 0 : i32
    return %c0_i32, %c0_i32_0 : i32, i32
  }
  func.func @transform_4(%arg0: i32) -> (i32, i32) {
    %c0_i32 = arith.constant 0 : i32
    %c0_i32_0 = arith.constant 0 : i32
    %c0_i32_1 = arith.constant 0 : i32
    return %c0_i32, %c0_i32_0 : i32, i32
  }
  func.func @transform_5(%arg0: i32) -> (i32, i32) {
    %c0_i32 = arith.constant 0 : i32
    %c0_i32_0 = arith.constant 0 : i32
    %c0_i32_1 = arith.constant 0 : i32
    return %c0_i32, %c0_i32_0 : i32, i32
  }
  func.func @transform_6(%arg0: i32) -> (i32, i32) {
    %c0_i32 = arith.constant 0 : i32
    %c0_i32_0 = arith.constant 0 : i32
    %c0_i32_1 = arith.constant 0 : i32
    return %c0_i32, %c0_i32_0 : i32, i32
  }
  func.func @transform_7(%arg0: i32) -> (i32, i32) {
    %c0_i32 = arith.constant 0 : i32
    %c0_i32_0 = arith.constant 0 : i32
    return %arg0, %c0_i32 : i32, i32
  }
}

module attributes {stable_mosaic.version = 11 : i64} {
  func.func @_autoencoder_kernel(%arg0: i32, %arg1: memref<8x32xf32, #tpu.memory_space<vmem>>, %arg2: memref<32x8xf32, #tpu.memory_space<vmem>>, %arg3: memref<1x8xf32, #tpu.memory_space<vmem>>, %arg4: memref<8x8xf32, #tpu.memory_space<vmem>>, %arg5: memref<1x8xf32, #tpu.memory_space<vmem>>, %arg6: memref<8x32xf32, #tpu.memory_space<vmem>>, %arg7: memref<1x32xf32, #tpu.memory_space<vmem>>, %arg8: memref<8x32xf32, #tpu.memory_space<vmem>>) attributes {dimension_semantics = [#tpu.dimension_semantics<parallel>], iteration_bounds = array<i64: 2>, scalar_prefetch = 0 : i64, scratch_operands = 0 : i64, tpu.core_type = #tpu.core_type<tc>, window_params = [{transform_indices = @transform_0, window_bounds = array<i64: 8, 32>}, {pipeline_mode = #tpu.pipeline_mode<synchronous>, transform_indices = @transform_1, window_bounds = array<i64: 32, 8>}, {pipeline_mode = #tpu.pipeline_mode<synchronous>, transform_indices = @transform_2, window_bounds = array<i64: 1, 8>}, {pipeline_mode = #tpu.pipeline_mode<synchronous>, transform_indices = @transform_3, window_bounds = array<i64: 8, 8>}, {pipeline_mode = #tpu.pipeline_mode<synchronous>, transform_indices = @transform_4, window_bounds = array<i64: 1, 8>}, {pipeline_mode = #tpu.pipeline_mode<synchronous>, transform_indices = @transform_5, window_bounds = array<i64: 8, 32>}, {pipeline_mode = #tpu.pipeline_mode<synchronous>, transform_indices = @transform_6, window_bounds = array<i64: 1, 32>}, {transform_indices = @transform_7, window_bounds = array<i64: 8, 32>}]} {
    %c0 = arith.constant 0 : index
    %c0_0 = arith.constant 0 : index
    %0 = vector.load %arg1[%c0, %c0_0] : memref<8x32xf32, #tpu.memory_space<vmem>>, vector<8x32xf32>
    %c0_1 = arith.constant 0 : index
    %c0_2 = arith.constant 0 : index
    %1 = vector.load %arg2[%c0_1, %c0_2] : memref<32x8xf32, #tpu.memory_space<vmem>>, vector<32x8xf32>
    %cst = arith.constant dense<0.000000e+00> : vector<8x8xf32>
    %2 = tpu.matmul %0, %1, %cst {dimension_numbers = #tpu.dot_dimension_numbers<[1], [0], [0], [1], [0, 0, 1, 1], [], []>} : vector<8x32xf32>, vector<32x8xf32>, vector<8x8xf32> -> vector<8x8xf32>
    %c0_3 = arith.constant 0 : index
    %c0_4 = arith.constant 0 : index
    %3 = vector.load %arg3[%c0_3, %c0_4] : memref<1x8xf32, #tpu.memory_space<vmem>>, vector<1x8xf32>
    %4 = vector.broadcast %3 : vector<1x8xf32> to vector<8x8xf32>
    %5 = arith.addf %2, %4 : vector<8x8xf32>
    %cst_5 = arith.constant 0.000000e+00 : f32
    %6 = vector.broadcast %cst_5 : f32 to vector<8x8xf32>
    %7 = arith.maximumf %5, %6 : vector<8x8xf32>
    %c0_6 = arith.constant 0 : index
    %c0_7 = arith.constant 0 : index
    %8 = vector.load %arg4[%c0_6, %c0_7] : memref<8x8xf32, #tpu.memory_space<vmem>>, vector<8x8xf32>
    %cst_8 = arith.constant dense<0.000000e+00> : vector<8x8xf32>
    %9 = tpu.matmul %7, %8, %cst_8 {dimension_numbers = #tpu.dot_dimension_numbers<[1], [0], [0], [1], [0, 0, 1, 1], [], []>} : vector<8x8xf32>, vector<8x8xf32>, vector<8x8xf32> -> vector<8x8xf32>
    %c0_9 = arith.constant 0 : index
    %c0_10 = arith.constant 0 : index
    %10 = vector.load %arg5[%c0_9, %c0_10] : memref<1x8xf32, #tpu.memory_space<vmem>>, vector<1x8xf32>
    %11 = vector.broadcast %10 : vector<1x8xf32> to vector<8x8xf32>
    %12 = arith.addf %9, %11 : vector<8x8xf32>
    %cst_11 = arith.constant 0.000000e+00 : f32
    %13 = vector.broadcast %cst_11 : f32 to vector<8x8xf32>
    %14 = arith.maximumf %12, %13 : vector<8x8xf32>
    %c0_12 = arith.constant 0 : index
    %c0_13 = arith.constant 0 : index
    %15 = vector.load %arg6[%c0_12, %c0_13] : memref<8x32xf32, #tpu.memory_space<vmem>>, vector<8x32xf32>
    %cst_14 = arith.constant dense<0.000000e+00> : vector<8x32xf32>
    %16 = tpu.matmul %14, %15, %cst_14 {dimension_numbers = #tpu.dot_dimension_numbers<[1], [0], [0], [1], [0, 0, 1, 1], [], []>} : vector<8x8xf32>, vector<8x32xf32>, vector<8x32xf32> -> vector<8x32xf32>
    %c0_15 = arith.constant 0 : index
    %c0_16 = arith.constant 0 : index
    %17 = vector.load %arg7[%c0_15, %c0_16] : memref<1x32xf32, #tpu.memory_space<vmem>>, vector<1x32xf32>
    %18 = vector.broadcast %17 : vector<1x32xf32> to vector<8x32xf32>
    %19 = arith.addf %16, %18 : vector<8x32xf32>
    %c0_17 = arith.constant 0 : index
    %c0_18 = arith.constant 0 : index
    %20 = vector.load %arg8[%c0_17, %c0_18] : memref<8x32xf32, #tpu.memory_space<vmem>>, vector<8x32xf32>
    tpu.vector_store %arg8[%c0_17, %c0_18], %19 {strides = array<i32>} : memref<8x32xf32, #tpu.memory_space<vmem>>, vector<8x32xf32>,
    return
  }
  func.func @transform_0(%arg0: i32) -> (i32, i32) {
    %c0_i32 = arith.constant 0 : i32
    %c0_i32_0 = arith.constant 0 : i32
    return %arg0, %c0_i32 : i32, i32
  }
  func.func @transform_1(%arg0: i32) -> (i32, i32) {
    %c0_i32 = arith.constant 0 : i32
    %c0_i32_0 = arith.constant 0 : i32
    %c0_i32_1 = arith.constant 0 : i32
    return %c0_i32, %c0_i32_0 : i32, i32
  }
  func.func @transform_2(%arg0: i32) -> (i32, i32) {
    %c0_i32 = arith.constant 0 : i32
    %c0_i32_0 = arith.constant 0 : i32
    %c0_i32_1 = arith.constant 0 : i32
    return %c0_i32, %c0_i32_0 : i32, i32
  }
  func.func @transform_3(%arg0: i32) -> (i32, i32) {
    %c0_i32 = arith.constant 0 : i32
    %c0_i32_0 = arith.constant 0 : i32
    %c0_i32_1 = arith.constant 0 : i32
    return %c0_i32, %c0_i32_0 : i32, i32
  }
  func.func @transform_4(%arg0: i32) -> (i32, i32) {
    %c0_i32 = arith.constant 0 : i32
    %c0_i32_0 = arith.constant 0 : i32
    %c0_i32_1 = arith.constant 0 : i32
    return %c0_i32, %c0_i32_0 : i32, i32
  }
  func.func @transform_5(%arg0: i32) -> (i32, i32) {
    %c0_i32 = arith.constant 0 : i32
    %c0_i32_0 = arith.constant 0 : i32
    %c0_i32_1 = arith.constant 0 : i32
    return %c0_i32, %c0_i32_0 : i32, i32
  }
  func.func @transform_6(%arg0: i32) -> (i32, i32) {
    %c0_i32 = arith.constant 0 : i32
    %c0_i32_0 = arith.constant 0 : i32
    %c0_i32_1 = arith.constant 0 : i32
    return %c0_i32, %c0_i32_0 : i32, i32
  }
  func.func @transform_7(%arg0: i32) -> (i32, i32) {
    %c0_i32 = arith.constant 0 : i32
    %c0_i32_0 = arith.constant 0 : i32
    return %arg0, %c0_i32 : i32, i32
  }
}

</mosaic_0001>

<bundles_post_ra>
// kernel: tpu_custom_call.1
= control target key start
LH: loop header
LB: loop body
LE: loop exit
PB: predicated region body
PF: predicated region fallthrough
CT: control target
= control target key end

     0   :  { %12 = vsyncpa [#allocation3], 0  ;;  %s933_s0 = inlined_call_operand.vmem [shape: f32[12,32], index: 0, kind: input, shape index: {}]   ;;  %s934_s1 = inlined_call_operand.vmem [shape: f32[32,8], index: 1, kind: input, shape index: {}]   ;;  %s935_s2 = inlined_call_operand.vmem [shape: f32[1,8], index: 2, kind: input, shape index: {}]   ;;  %s936_s3 = inlined_call_operand.vmem [shape: f32[8,8], index: 3, kind: input, shape index: {}]   ;;  %s937_s4 = inlined_call_operand.vmem [shape: f32[1,8], index: 4, kind: input, shape index: {}]   ;;  %s938_s5 = inlined_call_operand.vmem [shape: f32[8,32], index: 5, kind: input, shape index: {}]   ;;  %s939_s6 = inlined_call_operand.vmem [shape: f32[1,32], index: 6, kind: input, shape index: {}]   ;;  %s940_s7 = inlined_call_operand.hbm [shape: f32[12,32], index: 7, kind: output, shape index: {}]  }
   0x1   :  { %14 = vsyncpa [#allocation3 + $0x1], 0  ;;  %s801_s24 = smov 0   ;;  %s803_s25 = smov 0  }
   0x2   :  { %s805_s26 = smov 0   ;;  %s807_s27 = smov 0  }
   0x3 LB: > { %s822_s28 = sadd.s32 4294967295, %s755_s27   ;;  %s599_s29 = sadd.s32 4294967294, %s755_s27   ;;  %s755_s27 = sphi %s807_s27, %s946_s27   ;;  %s751_s26 = sphi %s805_s26, %s945_s26   ;;  %s747_s25 = sphi %s803_s25, %s944_s25   ;;  %s743_s24 = sphi %s801_s24, %s943_s24  }
   0x4   : > { %s826_s30 = sadd.s32 1, %s755_s27   ;;  %s179_s8 = sadd.s32 1, %s751_s26 }
   0x5   : > { %s176_s9 = ssub.s32 %s755_s27, %s826_s30  ;;  %p189_p0 = scmp.ne.s32.totalorder %s751_s26, %s747_s25 }
   0x6   : > { %p177_p1 = scmp.eq.s32.totalorder %s176_s9, 0  ;;  %p190_p2 = scmp.eq.s32.totalorder %s822_s28, 1 }
   0x7   : > { %p195_p3 = scmp.ne.s32.totalorder %s747_s25, %s743_s24  ;;  %p196_p4 = scmp.eq.s32.totalorder %s599_s29, 1 }
   0x8   : > { %s837_s10 = scalar_select %p177_p1, %s751_s26, %s179_s8  }
   0x9   : > { %p839_p5 = por %p190_p2, %p189_p0  ;;  %p843_p6 = por %p196_p4, %p195_p3 }
   0xa   : > { %p602_p7 = scmp.ge.s32.totalorder %s755_s27, 1  ;;  %p239_p8 = scmp.lt.s32.totalorder %s755_s27, 3 }
   0xc   : > { %p240_p9 = pnand %p602_p7, %p239_p8 }
   0xd   : > { %v275_v0 = vld [vmem:[%s934_s1] sm:$0xff] (!%p240_p9)  ;;  %v276_v1 = vld [vmem:[%s934_s1 + $0x8] sm:$0xff] (!%p240_p9)  ;;  %v277_v2 = vld [vmem:[%s934_s1 + $0x10] sm:$0xff] (!%p240_p9)  ;;  %v757_v3 = vmov (!%p240_p9), 0.0|0.0   ;;  %vm758_vm0 = vmmov (!%p240_p9), 0   ;;  %v759_v6 = vmov (!%p240_p9), 0.0  }
   0xe   : > { %243 = sbr.rel (%p240_p9) target bundleno = 686 (0x2ae), region = 48  ;;  %645 = vmatprep.subr.bf16.mxu0 (!%p240_p9), %v757_v3  ;;  %v646_v4 = vpack.c.bf16 (!%p240_p9), %v276_v1, %v275_v0  ;;  %v278_v5 = vld [vmem:[%s934_s1 + $0x18] sm:$0xff] (!%p240_p9)  ;;  %632 = vmatprep.mubr.msk.f32.mxu0 (!%p240_p9), %vm758_vm0, %v759_v6  ;;  %p270_p10 = scmp.lt.s32.totalorder (!%p240_p9), %s822_s28, 1  ;;  %vm286_vm1 = vcmask (!%p240_p9), 261120   ;;  %v361_v9 = vld [vmem:[%s936_s3] sm:$0xff] (!%p240_p9)  ;;  %vm369_vm2 = vcmask (!%p240_p9), 64512  }
   0xf   : > { %635 = vmatprep.subr.mxu1 (!%p240_p9), %v759_v6  ;;  %637 = vmatprep.mubr.msk.f32.mxu1 (!%p240_p9), %vm758_vm0, %v759_v6  ;;  %v649_v7 = vpack.c.bf16 (!%p240_p9), %v278_v5, %v277_v2  ;;  %v605_v10 = vld [vmem:[%s935_s2] ss:$0 sm:$0xff] (!%p240_p9)  ;;  %s267_s20 = sand.u32 (!%p240_p9), 1, %s747_s25   ;;  %s612_s29 = sshll.u32 (!%p240_p9), %s822_s28, 7 }
  0x10   : > { %647 = vmatpush3.bf16.msra.mxu0 (!%p240_p9), %v646_v4  ;;  %636 = vmatpush3.msra.mxu1 (!%p240_p9), %v361_v9  ;;  %v444_v15 = vld [vmem:[%s938_s5] sm:$0xff] (!%p240_p9)  ;;  %s890_s15 = scalar_lea.hbm (!%p240_p9), %s940_s7, %s612_s29  ;;  %s527_s16 = scalar_lea.sflag (!%p240_p9), [#allocation3], %s267_s20 }
  0x11   : > { %648 = vmatprep.subr.bf16.mxu0 (!%p240_p9), %v757_v3  ;;  %640 = vmatprep.subr.mxu1 (!%p240_p9), %v759_v6  ;;  %v607_v16 = vld [vmem:[%s937_s4] ss:$0 sm:$0xff] (!%p240_p9) }
  0x12   : > { %v609_v21 = vld [vmem:[%s939_s6] ss:$0 sm:$0xff] (!%p240_p9) }
  0x14   : > { %650 = vmatpush3.bf16.msra.mxu0 (!%p240_p9), %v649_v7 }
  0x15   : > { %s271_s21 = scalar_select %p270_p10, %s822_s28, 1 }
  0x16   : > { %s760_s28 = smov [#allocation2]  }
  0x17   : > { %s604_s22 = sshll.u32 %s271_s21, 3  ;;  %s603_s21 = sshll.u32 %s267_s20, 3 }
  0x18   : > { %s273_s8 = scalar_lea.vmem %s933_s0, %s604_s22  ;;  %s697_s18 = sshll.u32 %s760_s28, 4  ;;  %s698_s18 = int_to_ptr.vmem [resolvable:$false] %s697_s18 }
  0x19   : > { %v274_v8 = vld [vmem:[%s273_s8] sm:$0xff]  ;;  %s269_s8 = scalar_lea.vmem [#allocation2], %s603_s21  ;;  %s699_s19 = scalar_lea.vmem %s698_s18, 256 }
  0x1a   : > { %633 = vmatmul.mubr.msk.f32.vlgmr.msra.gmra.mrb[0].mxu0 %vm286_vm1, %v274_v8  ;;  %s540_s9 = sshll.u32 %s269_s8, 4  ;;  %s892_s9 = int_to_ptr.vmem [resolvable:$true] %s540_s9 }
  0x1b   : > { %s693_s17 = scalar_lea.vmem %s892_s9, 128  ;;  %p700_p0 = scmp.lt.s32.totalorder %s892_s9, %s698_s18 }
  0x1c   : > { %p694_p11 = scmp.ne.s32.totalorder %s892_s9, %s693_s17  ;;  %p701_p1 = scmp.lt.s32.totalorder %s699_s19, %s693_s17 }
  0x1e   : > { %p695_p12 = pnand %p694_p11, %p839_p5  ;;  %p702_p2 = por %p701_p1, %p700_p0 }
  0x20   : > { %p696_p13 = pneg %p695_p12 }
  0x22   : > { %p703_p3 = pnand %p702_p2, %p696_p13 }
  0xed   : > { %v356_v11 = vpop.f32.mrb[0].mxu0 }
  0xee   : > { %v357_v12 = vadd.f32 %v605_v10, %v356_v11  ;;  %v634_v13 = vpop.f32.mrb[1].mxu0 }
  0xf0   : > { %v360_v14 = vmax.f32 %v357_v12, 0.0 }
  0xf2   : > { %638 = vmatmul.mubr.msk.f32.vlgmr.msra.gmra.mrb[0].mxu1 %vm369_vm2, %v360_v14 }
  0xf3   : > { %642 = vmatprep.mubr.msk.f32.mxu1 %vm758_vm0, %v759_v6  ;;  %641 = vmatpush3.msra.mxu1 %v444_v15 }
 0x1c5   : > { %v439_v17 = vpop.f32.mrb[0].mxu1 }
 0x1c6   : > { %v440_v18 = vadd.f32 %v607_v16, %v439_v17  ;;  %v639_v19 = vpop.f32.mrb[1].mxu1 }
 0x1c8   : > { %v443_v20 = vmax.f32 %v440_v18, 0.0 }
 0x1ca   : > { %643 = vmatmul.mubr.msk.f32.vlgmr.msra.gmra.mrb[2].mxu1 %vm369_vm2, %v443_v20 }
 0x29d   : > { %v521_v22 = vpop.f32.mrb[2].mxu1 }
 0x29e   : > { %v522_v23 = vadd.f32 %v609_v21, %v521_v22  ;;  %v644_v24 = vpop.f32.mrb[3].mxu1 }
 0x2a0   : > { %525 = vst.msk [vmem:[%s269_s8] sm:$0xff] %vm286_vm1, %v522_v23 }
 0x2a1   : > { %706 = shalt.err (!%p703_p3)
}
 0x2a2   : > { %s707_s20 = scalar_lea.hbm %s890_s15, 128  ;;  %s711_s23 = scalar_lea.hbm %s940_s7, 256 }
 0x2a3   : > { %p708_p4 = scmp.ne.s32.totalorder %s890_s15, %s707_s20  ;;  %p712_p9 = scmp.lt.u32.totalorder %s890_s15, %s940_s7 }
 0x2a4   : > { %p713_p10 = scmp.lt.u32.totalorder %s711_s23, %s707_s20  ;;  %p715_p12 = scmp.lt.u32.totalorder %s707_s20, %s890_s15 }
 0x2a5   : > { %p709_p7 = pnand %p708_p4, %p839_p5 }
 0x2a6   : > { %p714_p11 = por %p713_p10, %p712_p9 }
 0x2a7   : > { %p710_p8 = pneg %p709_p7 }
 0x2a8   : > { %p716_p13 = por %p715_p12, %p714_p11 }
 0x2aa   : > { %p717_p0 = pnand %p716_p13, %p710_p8 }
 0x2ac   : > { %720 = shalt.err (!%p717_p0)
}
 0x2ad   : > { %651 = dma.vmem_to_hbm [thread:$0]  (%p839_p5), %s892_s9, 128, %s890_s15, %s527_s16  }
 0x2ae PF: > { %p657_p1 = scmp.ge.s32.totalorder %s755_s27, 2  ;;  %s552_s13 = sand.u32 1, %s743_s24  }
 0x2af   : > { %s553_s14 = scalar_lea.sflag [#allocation3], %s552_s13 }
 0x2b0   : > { %p654_p2 = pnand %p657_p1, %p843_p6 }
 0x2b2   : > { %738 = dma.done.wait (!%p654_p2), %s553_s14, 128  }
 0x2b3   : > { %740 = vsyncadd (!%p654_p2), %s553_s14, 4294967168  ;;  %p17_p3 = scmp.ge.s32.totalorder %s826_s30, 4   ;;  %s943_s24 = smov %s747_s25 }
 0x2b4   : > { %s944_s25 = smov %s751_s26  ;;  %s945_s26 = smov %s837_s10 }
 0x2b5   : > { %s946_s27 = smov %s826_s30  ;;  %19 = sbr.rel (!%p17_p3) target bundleno = 3 (0x3), region = 83 }
 0x2bc   :  { %558 = vsyncpa [#allocation3], 1 }
 0x2bd   :  { %560 = vsyncpa [#allocation3 + $0x1], 1 }

// kernel: tpu_custom_call.1
= control target key start
LH: loop header
LB: loop body
LE: loop exit
PB: predicated region body
PF: predicated region fallthrough
CT: control target
= control target key end

     0   :  { %12 = vsyncpa [#allocation3], 0  ;;  %s933_s0 = inlined_call_operand.vmem [shape: f32[12,32], index: 0, kind: input, shape index: {}]   ;;  %s934_s1 = inlined_call_operand.vmem [shape: f32[32,8], index: 1, kind: input, shape index: {}]   ;;  %s935_s2 = inlined_call_operand.vmem [shape: f32[1,8], index: 2, kind: input, shape index: {}]   ;;  %s936_s3 = inlined_call_operand.vmem [shape: f32[8,8], index: 3, kind: input, shape index: {}]   ;;  %s937_s4 = inlined_call_operand.vmem [shape: f32[1,8], index: 4, kind: input, shape index: {}]   ;;  %s938_s5 = inlined_call_operand.vmem [shape: f32[8,32], index: 5, kind: input, shape index: {}]   ;;  %s939_s6 = inlined_call_operand.vmem [shape: f32[1,32], index: 6, kind: input, shape index: {}]   ;;  %s940_s7 = inlined_call_operand.hbm [shape: f32[12,32], index: 7, kind: output, shape index: {}]  }
   0x1   :  { %14 = vsyncpa [#allocation3 + $0x1], 0  ;;  %s801_s24 = smov 0   ;;  %s803_s25 = smov 0  }
   0x2   :  { %s805_s26 = smov 0   ;;  %s807_s27 = smov 0  }
   0x3 LB: > { %s822_s28 = sadd.s32 4294967295, %s755_s27   ;;  %s599_s29 = sadd.s32 4294967294, %s755_s27   ;;  %s755_s27 = sphi %s807_s27, %s946_s27   ;;  %s751_s26 = sphi %s805_s26, %s945_s26   ;;  %s747_s25 = sphi %s803_s25, %s944_s25   ;;  %s743_s24 = sphi %s801_s24, %s943_s24  }
   0x4   : > { %s826_s30 = sadd.s32 1, %s755_s27   ;;  %s179_s8 = sadd.s32 1, %s751_s26 }
   0x5   : > { %s176_s9 = ssub.s32 %s755_s27, %s826_s30  ;;  %p189_p0 = scmp.ne.s32.totalorder %s751_s26, %s747_s25 }
   0x6   : > { %p177_p1 = scmp.eq.s32.totalorder %s176_s9, 0  ;;  %p190_p2 = scmp.eq.s32.totalorder %s822_s28, 1 }
   0x7   : > { %p195_p3 = scmp.ne.s32.totalorder %s747_s25, %s743_s24  ;;  %p196_p4 = scmp.eq.s32.totalorder %s599_s29, 1 }
   0x8   : > { %s837_s10 = scalar_select %p177_p1, %s751_s26, %s179_s8  }
   0x9   : > { %p839_p5 = por %p190_p2, %p189_p0  ;;  %p843_p6 = por %p196_p4, %p195_p3 }
   0xa   : > { %p602_p7 = scmp.ge.s32.totalorder %s755_s27, 1  ;;  %p239_p8 = scmp.lt.s32.totalorder %s755_s27, 3 }
   0xc   : > { %p240_p9 = pnand %p602_p7, %p239_p8 }
   0xd   : > { %v275_v0 = vld [vmem:[%s934_s1] sm:$0xff] (!%p240_p9)  ;;  %v276_v1 = vld [vmem:[%s934_s1 + $0x8] sm:$0xff] (!%p240_p9)  ;;  %v277_v2 = vld [vmem:[%s934_s1 + $0x10] sm:$0xff] (!%p240_p9)  ;;  %v757_v3 = vmov (!%p240_p9), 0.0|0.0   ;;  %vm758_vm0 = vmmov (!%p240_p9), 0   ;;  %v759_v6 = vmov (!%p240_p9), 0.0  }
   0xe   : > { %243 = sbr.rel (%p240_p9) target bundleno = 686 (0x2ae), region = 48  ;;  %645 = vmatprep.subr.bf16.mxu0 (!%p240_p9), %v757_v3  ;;  %v646_v4 = vpack.c.bf16 (!%p240_p9), %v276_v1, %v275_v0  ;;  %v278_v5 = vld [vmem:[%s934_s1 + $0x18] sm:$0xff] (!%p240_p9)  ;;  %632 = vmatprep.mubr.msk.f32.mxu0 (!%p240_p9), %vm758_vm0, %v759_v6  ;;  %p270_p10 = scmp.lt.s32.totalorder (!%p240_p9), %s822_s28, 1  ;;  %vm286_vm1 = vcmask (!%p240_p9), 261120   ;;  %v361_v9 = vld [vmem:[%s936_s3] sm:$0xff] (!%p240_p9)  ;;  %vm369_vm2 = vcmask (!%p240_p9), 64512  }
   0xf   : > { %635 = vmatprep.subr.mxu1 (!%p240_p9), %v759_v6  ;;  %637 = vmatprep.mubr.msk.f32.mxu1 (!%p240_p9), %vm758_vm0, %v759_v6  ;;  %v649_v7 = vpack.c.bf16 (!%p240_p9), %v278_v5, %v277_v2  ;;  %v605_v10 = vld [vmem:[%s935_s2] ss:$0 sm:$0xff] (!%p240_p9)  ;;  %s267_s20 = sand.u32 (!%p240_p9), 1, %s747_s25   ;;  %s612_s29 = sshll.u32 (!%p240_p9), %s822_s28, 7 }
  0x10   : > { %647 = vmatpush3.bf16.msra.mxu0 (!%p240_p9), %v646_v4  ;;  %636 = vmatpush3.msra.mxu1 (!%p240_p9), %v361_v9  ;;  %v444_v15 = vld [vmem:[%s938_s5] sm:$0xff] (!%p240_p9)  ;;  %s890_s15 = scalar_lea.hbm (!%p240_p9), %s940_s7, %s612_s29  ;;  %s527_s16 = scalar_lea.sflag (!%p240_p9), [#allocation3], %s267_s20 }
  0x11   : > { %648 = vmatprep.subr.bf16.mxu0 (!%p240_p9), %v757_v3  ;;  %640 = vmatprep.subr.mxu1 (!%p240_p9), %v759_v6  ;;  %v607_v16 = vld [vmem:[%s937_s4] ss:$0 sm:$0xff] (!%p240_p9) }
  0x12   : > { %v609_v21 = vld [vmem:[%s939_s6] ss:$0 sm:$0xff] (!%p240_p9) }
  0x14   : > { %650 = vmatpush3.bf16.msra.mxu0 (!%p240_p9), %v649_v7 }
  0x15   : > { %s271_s21 = scalar_select %p270_p10, %s822_s28, 1 }
  0x16   : > { %s760_s28 = smov [#allocation2]  }
  0x17   : > { %s604_s22 = sshll.u32 %s271_s21, 3  ;;  %s603_s21 = sshll.u32 %s267_s20, 3 }
  0x18   : > { %s273_s8 = scalar_lea.vmem %s933_s0, %s604_s22  ;;  %s697_s18 = sshll.u32 %s760_s28, 4  ;;  %s698_s18 = int_to_ptr.vmem [resolvable:$false] %s697_s18 }
  0x19   : > { %v274_v8 = vld [vmem:[%s273_s8] sm:$0xff]  ;;  %s269_s8 = scalar_lea.vmem [#allocation2], %s603_s21  ;;  %s699_s19 = scalar_lea.vmem %s698_s18, 256 }
  0x1a   : > { %633 = vmatmul.mubr.msk.f32.vlgmr.msra.gmra.mrb[0].mxu0 %vm286_vm1, %v274_v8  ;;  %s540_s9 = sshll.u32 %s269_s8, 4  ;;  %s892_s9 = int_to_ptr.vmem [resolvable:$true] %s540_s9 }
  0x1b   : > { %s693_s17 = scalar_lea.vmem %s892_s9, 128  ;;  %p700_p0 = scmp.lt.s32.totalorder %s892_s9, %s698_s18 }
  0x1c   : > { %p694_p11 = scmp.ne.s32.totalorder %s892_s9, %s693_s17  ;;  %p701_p1 = scmp.lt.s32.totalorder %s699_s19, %s693_s17 }
  0x1e   : > { %p695_p12 = pnand %p694_p11, %p839_p5  ;;  %p702_p2 = por %p701_p1, %p700_p0 }
  0x20   : > { %p696_p13 = pneg %p695_p12 }
  0x22   : > { %p703_p3 = pnand %p702_p2, %p696_p13 }
  0xed   : > { %v356_v11 = vpop.f32.mrb[0].mxu0 }
  0xee   : > { %v357_v12 = vadd.f32 %v605_v10, %v356_v11  ;;  %v634_v13 = vpop.f32.mrb[1].mxu0 }
  0xf0   : > { %v360_v14 = vmax.f32 %v357_v12, 0.0 }
  0xf2   : > { %638 = vmatmul.mubr.msk.f32.vlgmr.msra.gmra.mrb[0].mxu1 %vm369_vm2, %v360_v14 }
  0xf3   : > { %642 = vmatprep.mubr.msk.f32.mxu1 %vm758_vm0, %v759_v6  ;;  %641 = vmatpush3.msra.mxu1 %v444_v15 }
 0x1c5   : > { %v439_v17 = vpop.f32.mrb[0].mxu1 }
 0x1c6   : > { %v440_v18 = vadd.f32 %v607_v16, %v439_v17  ;;  %v639_v19 = vpop.f32.mrb[1].mxu1 }
 0x1c8   : > { %v443_v20 = vmax.f32 %v440_v18, 0.0 }
 0x1ca   : > { %643 = vmatmul.mubr.msk.f32.vlgmr.msra.gmra.mrb[2].mxu1 %vm369_vm2, %v443_v20 }
 0x29d   : > { %v521_v22 = vpop.f32.mrb[2].mxu1 }
 0x29e   : > { %v522_v23 = vadd.f32 %v609_v21, %v521_v22  ;;  %v644_v24 = vpop.f32.mrb[3].mxu1 }
 0x2a0   : > { %525 = vst.msk [vmem:[%s269_s8] sm:$0xff] %vm286_vm1, %v522_v23 }
 0x2a1   : > { %706 = shalt.err (!%p703_p3)
}
 0x2a2   : > { %s707_s20 = scalar_lea.hbm %s890_s15, 128  ;;  %s711_s23 = scalar_lea.hbm %s940_s7, 256 }
 0x2a3   : > { %p708_p4 = scmp.ne.s32.totalorder %s890_s15, %s707_s20  ;;  %p712_p9 = scmp.lt.u32.totalorder %s890_s15, %s940_s7 }
 0x2a4   : > { %p713_p10 = scmp.lt.u32.totalorder %s711_s23, %s707_s20  ;;  %p715_p12 = scmp.lt.u32.totalorder %s707_s20, %s890_s15 }
 0x2a5   : > { %p709_p7 = pnand %p708_p4, %p839_p5 }
 0x2a6   : > { %p714_p11 = por %p713_p10, %p712_p9 }
 0x2a7   : > { %p710_p8 = pneg %p709_p7 }
 0x2a8   : > { %p716_p13 = por %p715_p12, %p714_p11 }
 0x2aa   : > { %p717_p0 = pnand %p716_p13, %p710_p8 }
 0x2ac   : > { %720 = shalt.err (!%p717_p0)
}
 0x2ad   : > { %651 = dma.vmem_to_hbm [thread:$0]  (%p839_p5), %s892_s9, 128, %s890_s15, %s527_s16  }
 0x2ae PF: > { %p657_p1 = scmp.ge.s32.totalorder %s755_s27, 2  ;;  %s552_s13 = sand.u32 1, %s743_s24  }
 0x2af   : > { %s553_s14 = scalar_lea.sflag [#allocation3], %s552_s13 }
 0x2b0   : > { %p654_p2 = pnand %p657_p1, %p843_p6 }
 0x2b2   : > { %738 = dma.done.wait (!%p654_p2), %s553_s14, 128  }
 0x2b3   : > { %740 = vsyncadd (!%p654_p2), %s553_s14, 4294967168  ;;  %p17_p3 = scmp.ge.s32.totalorder %s826_s30, 4   ;;  %s943_s24 = smov %s747_s25 }
 0x2b4   : > { %s944_s25 = smov %s751_s26  ;;  %s945_s26 = smov %s837_s10 }
 0x2b5   : > { %s946_s27 = smov %s826_s30  ;;  %19 = sbr.rel (!%p17_p3) target bundleno = 3 (0x3), region = 83 }
 0x2bc   :  { %558 = vsyncpa [#allocation3], 1 }
 0x2bd   :  { %560 = vsyncpa [#allocation3 + $0x1], 1 }

</bundles_post_ra>
